<compile_context>
chip_gen: v5e
topology: v5e:2x2
jax: 0.10.0
libtpu: 0.0.40
codegen_flags: <defaults>
</compile_context>

<pallas_src>
import jax
import jax.numpy as jnp
from jax.experimental import pallas as pl
from jax.experimental.pallas import tpu as pltpu

# ---------------- model dims (small, consistent with the module) ----------------
C_IN = 4      # input channels
H = W = 16    # spatial
K = 3         # conv kernel
C_OUT = 8     # conv output channels
EMB = 32      # embedding dim
HID = 16      # predictor hidden dim

HW = H * W                     # 256 pixels per image
CK2 = C_IN * K * K             # 36 im2col rows (c, kh, kw)
CK2P = 40                      # padded to a multiple of 8 for tile alignment

# --------- packed parameter slab layout (rows of an (SLAB_ROWS, 128) buffer) ------
# Every block starts on a multiple-of-8 row so slices begin on a sublane tile.
ROW_WC = 0                     # rows 0:8,   cols 0:40 -> conv weight wcT (C_OUT, CK2P)
ROW_BC = 8                     # rows 8:16,  col  0    -> conv bias as a column (C_OUT, 1)
ROW_WF = 16                    # rows 16:24, cols 0:16 -> fused (w_emb @ w1)/(H*W)
ROW_B1 = 24                    # row  24,    cols 0:16 -> predictor fc1 bias
ROW_W2 = 32                    # row  32,    cols 0:16 -> predictor fc2 weight (row)
ROW_B2 = 40                    # row  40,    col  0    -> predictor fc2 bias
SLAB_ROWS = 48


# ---------------------------- the fused Pallas kernel ----------------------------
def fr_kernel(patches_ref,     # (CK2P, 2*HW) transposed im2col patches of both images
              params_ref,      # (SLAB_ROWS, 128) packed parameter slab
              out_ref):        # (1, 128) lane-dense output; lanes 0,1 = [1-y, y]
    wc = params_ref[ROW_WC:ROW_WC + C_OUT, 0:CK2P]       # (8, 40)
    bc = params_ref[ROW_BC:ROW_BC + C_OUT, 0:1]          # (8, 1)
    wf = params_ref[ROW_WF:ROW_WF + C_OUT, 0:HID]        # (8, 16)
    b1 = params_ref[ROW_B1:ROW_B1 + 1, 0:HID]            # (1, 16)
    w2 = params_ref[ROW_W2:ROW_W2 + 1, 0:HID]            # (1, 16)
    b2 = params_ref[ROW_B2:ROW_B2 + 1, 0:1]              # (1, 1)

    # Conv as ONE MXU matmul with a lane-dense (8, 512) activation, + bias, ReLU.
    conv = jnp.dot(wc, patches_ref[...],
                   preferred_element_type=jnp.float32) + bc
    conv = jnp.maximum(conv, 0.0)

    # Pooled difference in one pass: +1 for image-1 lanes (0..255), -1 for
    # image-2 lanes (256..511), then a single cross-lane reduce.  The 1/(H*W)
    # average-pool scale is folded into wf; the embed bias cancels in e1 - e2.
    lane = jax.lax.broadcasted_iota(jnp.int32, (C_OUT, 2 * HW), 1)
    sign = jnp.where(lane < HW, 1.0, -1.0)
    d = jnp.sum(conv * sign, axis=1, keepdims=True)      # (8, 1)

    # (embed Linear ∘ predictor fc1) fused -> ReLU (kept in row form, one tile).
    h = jnp.sum(d * wf, axis=0, keepdims=True) + b1      # (1, 16)
    h = jnp.maximum(h, 0.0)

    # predictor fc2 -> sigmoid.
    logit = jnp.sum(h * w2, axis=-1, keepdims=True) + b2  # (1, 1)
    y = jax.nn.sigmoid(logit)

    # Lane-dense output row: lane 0 = 1 - y, lanes >= 1 = y (only lanes 0..1 are
    # meaningful; the wrapper slices [:2]).
    lane_o = jax.lax.broadcasted_iota(jnp.int32, (1, 128), 1)
    yb = jnp.broadcast_to(y, (1, 128))
    out_ref[...] = jnp.where(lane_o >= 1, yb, 1.0 - yb)


# -------------------------------- JAX glue ---------------------------------------
def build_patches_t(pair):
    """pair: (2, C, H, W) float32 -> (CK2P, 2*H*W) transposed im2col patches.

    Rows are ordered (c, kh, kw) to match w_conv.reshape(C_OUT, CK2); columns are
    (image, h, w), so image 1 occupies lanes 0..HW-1 and image 2 lanes HW..2*HW-1.
    Rows CK2..CK2P-1 are zero padding (K aligned to a multiple of 8)."""
    padded = jnp.pad(pair, ((0, 0), (0, 0), (1, 1), (1, 1)))       # (2, C, H+2, W+2)
    windows = [padded[:, :, di:di + H, dj:dj + W]
               for di in range(K) for dj in range(K)]               # 9 x (2, C, H, W)
    w = jnp.stack(windows, axis=2)                                   # (2, C, 9, H, W)
    pt = jnp.transpose(w, (1, 2, 0, 3, 4)).reshape(CK2, 2 * HW)      # (36, 512)
    return jnp.pad(pt, ((0, CK2P - CK2), (0, 0)))                    # (40, 512)


def pack_params(params):
    """Pack all weights into one lane-dense (SLAB_ROWS, 128) f32 slab.

    Call ONCE (params don't change per forward); the finished slab is reused by
    every fr_api_forward call, so the per-call path carries no repacking HLO."""
    # PyTorch conv weight (Cout, Cin, kh, kw) -> (Cout, Cin*kh*kw) matching patch rows.
    wcT = params["w_conv"].reshape(C_OUT, CK2)                       # (8, 36)
    # Fold embed Linear into fc1 (b_emb cancels in e1-e2); fold 1/(H*W) pool scale.
    w_fused = (params["w_emb"] @ params["w1"]) * (1.0 / HW)          # (8, 16)

    slab = jnp.zeros((SLAB_ROWS, 128), jnp.float32)
    slab = slab.at[ROW_WC:ROW_WC + C_OUT, 0:CK2].set(wcT)            # cols 36..39 stay 0
    slab = slab.at[ROW_BC:ROW_BC + C_OUT, 0].set(params["b_conv"])
    slab = slab.at[ROW_WF:ROW_WF + C_OUT, 0:HID].set(w_fused)
    slab = slab.at[ROW_B1, 0:HID].set(params["b1"])
    slab = slab.at[ROW_W2, 0:HID].set(params["w2"][:, 0])
    slab = slab.at[ROW_B2, 0].set(params["b2"][0])
    return slab


def make_params(key):
    ks = jax.random.split(key, 8)
    s = 0.1
    w_conv = jax.random.normal(ks[0], (C_OUT, C_IN, K, K), jnp.float32) * s
    b_conv = jax.random.normal(ks[1], (C_OUT,), jnp.float32) * s
    w_emb = jax.random.normal(ks[2], (C_OUT, EMB), jnp.float32) * s
    b_emb = jax.random.normal(ks[3], (EMB,), jnp.float32) * s
    w1 = jax.random.normal(ks[4], (EMB, HID), jnp.float32) * s
    b1 = jax.random.normal(ks[5], (HID,), jnp.float32) * s
    w2 = jax.random.normal(ks[6], (HID, 1), jnp.float32) * s
    b2 = jax.random.normal(ks[7], (1,), jnp.float32) * s
    return dict(w_conv=w_conv, b_conv=b_conv, w_emb=w_emb, b_emb=b_emb,
                w1=w1, b1=b1, w2=w2, b2=b2)


@jax.jit
def fr_api_forward(x, slab):
    """x: (N_pairs, 2, C, H, W) float32; slab: pre-packed (SLAB_ROWS, 128) params.

    Uses only x[0], like the PyTorch forward. Returns [1 - p_same, p_same] of shape (2,).
    """
    pair = x[0]                                                      # (2, C, H, W)
    patches = build_patches_t(pair)                                  # (40, 512)

    vmem = pl.BlockSpec(memory_space=pltpu.MemorySpace.VMEM)
    out = pl.pallas_call(
        fr_kernel,
        out_shape=jax.ShapeDtypeStruct((1, 128), jnp.float32),
        in_specs=[vmem, vmem],
        out_specs=vmem,
        compiler_params=pltpu.CompilerParams(
            # Let XLA fuse the im2col patch-building producer into the kernel
            # input instead of materializing it in HBM first.
            allow_input_fusion=[True, False]),
    )(patches, slab)
    return out[0, :2]                                                # (2,)


# -------------------------------- reference --------------------------------------
def fr_api_reference(x, params):
    def embed(img):
        pad = jnp.pad(img, ((0, 0), (1, 1), (1, 1)))[None]           # (1, C, H+2, W+2)
        conv = jax.lax.conv_general_dilated(
            pad, params["w_conv"], (1, 1), "VALID",
            dimension_numbers=("NCHW", "OIHW", "NCHW"))
        conv = conv + params["b_conv"][None, :, None, None]
        conv = jnp.maximum(conv, 0.0)
        pooled = conv.mean(axis=(2, 3))                               # (1, C_OUT)
        return pooled @ params["w_emb"] + params["b_emb"]             # (1, EMB)

    e1 = embed(x[0, 0])
    e2 = embed(x[0, 1])
    d = e1 - e2
    h = jnp.maximum(d @ params["w1"] + params["b1"], 0.0)
    y = jax.nn.sigmoid(h @ params["w2"] + params["b2"])               # (1, 1)
    return jnp.concatenate([1.0 - y, y], axis=-1)[0]                  # (2,)


if __name__ == "__main__":
    key = jax.random.PRNGKey(0)
    kx, kp = jax.random.split(key)
    x = jax.random.normal(kx, (1, 2, C_IN, H, W), jnp.float32)        # (pairs, 2, C, H, W)
    params = make_params(kp)

    # Pack the parameter slab ONCE; every forward reuses it.
    slab = jax.block_until_ready(pack_params(params))

    out = fr_api_forward(x, slab)
    jax.block_until_ready(out)

    ref = fr_api_reference(x, params)
    assert out.shape == (2,)
    assert jnp.allclose(out.sum(), 1.0, atol=1e-5)                    # [1-p, p] sums to 1
    assert jnp.allclose(out, ref, atol=1e-5), (out, ref)
    print("KERNEL_OK")
</pallas_src>

<mosaic_0001>
module attributes {stable_mosaic.version = 11 : i64} {
  func.func @fr_kernel(%arg0: memref<40x512xf32, #tpu.memory_space<vmem>>, %arg1: memref<48x128xf32, #tpu.memory_space<vmem>>, %arg2: memref<1x128xf32, #tpu.memory_space<vmem>>) attributes {dimension_semantics = [], scalar_prefetch = 0 : i64, scratch_operands = 0 : i64, tpu.core_type = #tpu.core_type<tc>} {
    %c0 = arith.constant 0 : index
    %c0_0 = arith.constant 0 : index
    %0 = vector.load %arg1[%c0, %c0_0] : memref<48x128xf32, #tpu.memory_space<vmem>>, vector<8x40xf32>
    %c8 = arith.constant 8 : index
    %c0_1 = arith.constant 0 : index
    %1 = vector.load %arg1[%c8, %c0_1] : memref<48x128xf32, #tpu.memory_space<vmem>>, vector<8x1xf32>
    %c16 = arith.constant 16 : index
    %c0_2 = arith.constant 0 : index
    %2 = vector.load %arg1[%c16, %c0_2] : memref<48x128xf32, #tpu.memory_space<vmem>>, vector<8x16xf32>
    %c24 = arith.constant 24 : index
    %c0_3 = arith.constant 0 : index
    %3 = vector.load %arg1[%c24, %c0_3] : memref<48x128xf32, #tpu.memory_space<vmem>>, vector<1x16xf32>
    %c32 = arith.constant 32 : index
    %c0_4 = arith.constant 0 : index
    %4 = vector.load %arg1[%c32, %c0_4] : memref<48x128xf32, #tpu.memory_space<vmem>>, vector<1x16xf32>
    %c40 = arith.constant 40 : index
    %c0_5 = arith.constant 0 : index
    %5 = vector.load %arg1[%c40, %c0_5] : memref<48x128xf32, #tpu.memory_space<vmem>>, vector<1x1xf32>
    %c0_6 = arith.constant 0 : index
    %c0_7 = arith.constant 0 : index
    %6 = vector.load %arg0[%c0_6, %c0_7] : memref<40x512xf32, #tpu.memory_space<vmem>>, vector<40x512xf32>
    %cst = arith.constant dense<0.000000e+00> : vector<8x512xf32>
    %7 = tpu.matmul %0, %6, %cst {dimension_numbers = #tpu.dot_dimension_numbers<[1], [0], [0], [1], [0, 0, 1, 1], [], []>} : vector<8x40xf32>, vector<40x512xf32>, vector<8x512xf32> -> vector<8x512xf32>
    %8 = vector.broadcast %1 : vector<8x1xf32> to vector<8x512xf32>
    %9 = arith.addf %7, %8 : vector<8x512xf32>
    %cst_8 = arith.constant 0.000000e+00 : f32
    %10 = vector.broadcast %cst_8 : f32 to vector<8x512xf32>
    %11 = arith.maximumf %9, %10 : vector<8x512xf32>
    %12 = tpu.iota {dimensions = array<i32: 1>} : vector<8x512xi32>
    %c256_i32 = arith.constant 256 : i32
    %13 = vector.broadcast %c256_i32 : i32 to vector<8x512xi32>
    %14 = arith.cmpi slt, %12, %13 : vector<8x512xi32>
    %cst_9 = arith.constant 1.000000e+00 : f32
    %cst_10 = arith.constant -1.000000e+00 : f32
    %15 = vector.broadcast %cst_9 : f32 to vector<8x512xf32>
    %16 = vector.broadcast %cst_10 : f32 to vector<8x512xf32>
    %17 = arith.select %14, %15, %16 : vector<8x512xi1>, vector<8x512xf32>
    %18 = arith.mulf %11, %17 : vector<8x512xf32>
    %cst_11 = arith.constant dense<0.000000e+00> : vector<8xf32>
    %19 = vector.multi_reduction <add>, %18, %cst_11 [1] : vector<8x512xf32> to vector<8xf32>
    %20 = vector.shape_cast %19 : vector<8xf32> to vector<8x1xf32>
    %21 = vector.broadcast %20 : vector<8x1xf32> to vector<8x16xf32>
    %22 = arith.mulf %21, %2 : vector<8x16xf32>
    %cst_12 = arith.constant dense<0.000000e+00> : vector<16xf32>
    %23 = vector.multi_reduction <add>, %22, %cst_12 [0] : vector<8x16xf32> to vector<16xf32>
    %24 = vector.shape_cast %23 : vector<16xf32> to vector<1x16xf32>
    %25 = arith.addf %24, %3 : vector<1x16xf32>
    %cst_13 = arith.constant 0.000000e+00 : f32
    %26 = vector.broadcast %cst_13 : f32 to vector<1x16xf32>
    %27 = arith.maximumf %25, %26 : vector<1x16xf32>
    %28 = arith.mulf %27, %4 : vector<1x16xf32>
    %cst_14 = arith.constant dense<0.000000e+00> : vector<1xf32>
    %29 = vector.multi_reduction <add>, %28, %cst_14 [1] : vector<1x16xf32> to vector<1xf32>
    %30 = vector.shape_cast %29 : vector<1xf32> to vector<1x1xf32>
    %31 = arith.addf %30, %5 : vector<1x1xf32>
    %32 = arith.negf %31 : vector<1x1xf32>
    %33 = math.exp %32 : vector<1x1xf32>
    %cst_15 = arith.constant 1.000000e+00 : f32
    %34 = vector.broadcast %cst_15 : f32 to vector<1x1xf32>
    %35 = arith.addf %34, %33 : vector<1x1xf32>
    %36 = arith.divf %34, %35 : vector<1x1xf32>
    %37 = tpu.iota {dimensions = array<i32: 1>} : vector<1x128xi32>
    %38 = vector.shape_cast %36 : vector<1x1xf32> to vector<1x1xf32>
    %39 = vector.broadcast %38 : vector<1x1xf32> to vector<1x128xf32>
    %c1_i32 = arith.constant 1 : i32
    %40 = vector.broadcast %c1_i32 : i32 to vector<1x128xi32>
    %41 = arith.cmpi sge, %37, %40 : vector<1x128xi32>
    %cst_16 = arith.constant 1.000000e+00 : f32
    %42 = vector.broadcast %cst_16 : f32 to vector<1x128xf32>
    %43 = arith.subf %42, %39 : vector<1x128xf32>
    %44 = arith.select %41, %39, %43 : vector<1x128xi1>, vector<1x128xf32>
    %c0_17 = arith.constant 0 : index
    %c0_18 = arith.constant 0 : index
    %45 = vector.load %arg2[%c0_17, %c0_18] : memref<1x128xf32, #tpu.memory_space<vmem>>, vector<1x128xf32>
    tpu.vector_store %arg2[%c0_17, %c0_18], %44 {strides = array<i32>} : memref<1x128xf32, #tpu.memory_space<vmem>>, vector<1x128xf32>,
    return
  }
}

</mosaic_0001>

<bundles_post_ra>
// kernel: fr_api_forward.2
= control target key start
LH: loop header
LB: loop body
LE: loop exit
PB: predicated region body
PF: predicated region fallthrough
CT: control target
= control target key end

     0   :  { %v189_v1 = vlaneseq  ;;  %v452_v2 = vmov 0   ;;  %vm262_vm1 = vcmask 326656   ;;  %vm373_vm2 = vcmask 130048   ;;  %s559_s0 = inlined_call_operand.vmem [shape: f32[48,128], index: 0, kind: input, shape index: {}]   ;;  %s560_s1 = inlined_call_operand.vmem [shape: f32[36,512], index: 1, kind: input, shape index: {}]   ;;  %s561_s2 = inlined_call_operand.<no memory space> [shape: f32[], index: 2, kind: input, shape index: {}]   ;;  %s562_s3 = inlined_call_operand.vmem [shape: f32[1,128], index: 3, kind: output, shape index: {}]  }
   0x1   :  { %v8_v0 = vstv %s561_s2  ;;  %446 = vset.pattern.permute.xlu0 %v452_v2  ;;  %447 = vset.pattern.permute.xlu1 %v452_v2  ;;  %v438_v4 = vld [vmem:[%s560_s1 + $0x90] sm:$0xff]  ;;  %v439_v6 = vld [vmem:[%s560_s1 + $0x98] sm:$0xff]  ;;  %v436_v7 = vld [vmem:[%s560_s1 + $0x80] sm:$0xff]  ;;  %vm384_vm3 = vcmask 122880  }
   0x2   :  { %v190_v3 = vshrl.u32 %v189_v1, 7  ;;  %v437_v8 = vld [vmem:[%s560_s1 + $0x88] sm:$0xff]  ;;  %v434_v11 = vld [vmem:[%s560_s1 + $0x70] sm:$0xff]  ;;  %v435_v12 = vld [vmem:[%s560_s1 + $0x78] sm:$0xff] }
   0x3   :  { %v432_v15 = vld [vmem:[%s560_s1 + $0x60] sm:$0xff]  ;;  %v433_v16 = vld [vmem:[%s560_s1 + $0x68] sm:$0xff]  ;;  %v430_v17 = vld [vmem:[%s560_s1 + $0x50] sm:$0xff] }
   0x4   :  { %v191_v5 = vadd.s32 32, %v190_v3  ;;  %v431_v18 = vld [vmem:[%s560_s1 + $0x58] sm:$0xff]  ;;  %v428_v19 = vld [vmem:[%s560_s1 + $0x40] sm:$0xff]  ;;  %v429_v20 = vld [vmem:[%s560_s1 + $0x48] sm:$0xff] }
   0x5   :  { %v426_v21 = vld [vmem:[%s560_s1 + $0x30] sm:$0xff]  ;;  %v427_v22 = vld [vmem:[%s560_s1 + $0x38] sm:$0xff]  ;;  %v424_v23 = vld [vmem:[%s560_s1 + $0x20] sm:$0xff] }
   0x6   :  { %vm192_vm0 = vcmp.lt.s32.totalorder %v191_v5, 36  ;;  %v425_v24 = vld [vmem:[%s560_s1 + $0x28] sm:$0xff]  ;;  %v422_v25 = vld [vmem:[%s560_s1 + $0x10] sm:$0xff]  ;;  %v423_v26 = vld [vmem:[%s560_s1 + $0x18] sm:$0xff] }
   0x7   :  { %v215_v9 = vsel %vm192_vm0, %v438_v4, %v8_v0  ;;  %v226_v10 = vsel %vm192_vm0, %v439_v6, %v8_v0  ;;  %v193_v13 = vsel %vm192_vm0, %v436_v7, %v8_v0  ;;  %v204_v14 = vsel %vm192_vm0, %v437_v8, %v8_v0  ;;  %v231_v27 = vld [vmem:[%s559_s0] sm:$0xff]  ;;  %v421_v29 = vld [vmem:[%s560_s1 + $0x8] sm:$0xff]  ;;  %v233_v49 = vld [vmem:[%s559_s0 + $0x10] sm:$0xff] }
   0x8   :  { %317 = vmatpush.msra.mxu2 %v215_v9  ;;  %337 = vmatpush.msra.mxu3 %v226_v10  ;;  %v13_v28 = vld [vmem:[%s560_s1] sm:$0xff]  ;;  %v232_v30 = vld [vmem:[%s559_s0 + $0x8] sm:$0xff]  ;;  %v234_v58 = vld [vmem:[%s559_s0 + $0x18] sm:$0x1] }
   0x9   :  { %277 = vmatpush.msra.mxu0 %v193_v13  ;;  %297 = vmatpush.msra.mxu1 %v204_v14  ;;  %v235_v61 = vld [vmem:[%s559_s0 + $0x20] sm:$0x1]  ;;  %v236_v2 = vld [vmem:[%s559_s0 + $0x28] sm:$0x1] }
   0xa   :  { %318 = vmatpush.msra.mxu2 %v434_v11  ;;  %338 = vmatpush.msra.mxu3 %v435_v12 }
   0xb   :  { %278 = vmatpush.msra.mxu0 %v432_v15  ;;  %298 = vmatpush.msra.mxu1 %v433_v16 }
   0xc   :  { %319 = vmatpush.msra.mxu2 %v430_v17  ;;  %339 = vmatpush.msra.mxu3 %v431_v18  ;;  %v351_v18 = vand.u32 127, %v189_v1 }
   0xd   :  { %279 = vmatpush.msra.mxu0 %v428_v19  ;;  %299 = vmatpush.msra.mxu1 %v429_v20 }
   0xe   :  { %320 = vmatpush.msra.mxu2 %v426_v21  ;;  %340 = vmatpush.msra.mxu3 %v427_v22  ;;  %vm413_vm8 = vcmp.ge.s32.totalorder %v351_v18, 1 }
   0xf   :  { %280 = vmatpush.msra.mxu0 %v424_v23  ;;  %300 = vmatpush.msra.mxu1 %v425_v24 }
  0x10   :  { %321 = vmatpush.msra.mxu2 %v422_v25  ;;  %341 = vmatpush.msra.mxu3 %v423_v26 }
  0x11   :  { %442 = vmatmul.msk.f32.vlgmr.msra.gmra.mxu2 %vm262_vm1, %v231_v27  ;;  %443 = vmatmul.msk.f32.vlgmr.msra.gmra.mxu3 %vm262_vm1, %v231_v27 }
  0x12   :  { %281 = vmatpush.msra.mxu0 %v13_v28  ;;  %301 = vmatpush.msra.mxu1 %v421_v29 }
  0x13   :  { %440 = vmatmul.msk.f32.vlgmr.msra.gmra.mxu0 %vm262_vm1, %v231_v27  ;;  %441 = vmatmul.msk.f32.vlgmr.msra.gmra.mxu1 %vm262_vm1, %v231_v27 }
  0x14   :  { %259 = vperm.xlu0 %446, %v232_v30  }
  0x86   :  { %v260_v31 = vpop.permute.xlu0 %259 }
  0x90   :  { %v283_v32 = vpop.f32.mrf.mxu0  ;;  %v303_v33 = vpop.f32.mrf.mxu1 }
  0x91   :  { %v284_v34 = vadd.f32 %v283_v32, %v260_v31  ;;  %v304_v35 = vadd.f32 %v303_v33, %v260_v31 }
  0x93   :  { %v346_v36 = vmax.f32 %v284_v34, 0.0  ;;  %v347_v37 = vmax.f32 %v304_v35, 0.0 }
  0x94   :  { %v323_v38 = vpop.f32.mrf.mxu2  ;;  %v343_v39 = vpop.f32.mrf.mxu3 }
  0x95   :  { %v324_v40 = vadd.f32 %v323_v38, %v260_v31  ;;  %v344_v41 = vadd.f32 %v343_v39, %v260_v31  ;;  %v367_v42 = vadd.f32 %v347_v37, %v346_v36 }
  0x97   :  { %v348_v43 = vmax.f32 %v324_v40, 0.0  ;;  %v349_v44 = vmax.f32 %v344_v41, 0.0 }
  0x99   :  { %v365_v45 = vmul.f32 -1.0, %v348_v43  ;;  %v366_v46 = vmul.f32 -1.0, %v349_v44 }
  0x9b   :  { %v368_v47 = vadd.f32 %v367_v42, %v365_v45 }
  0x9d   :  { %v369_v48 = vadd.f32 %v368_v47, %v366_v46 }
  0x9f   :  { %370 = vadd.xlane.f32.xlu0 %v369_v48 }
 0x112   :  { %v371_v50 = vpop.xlane.xlu0 %370 }
 0x113   :  { %v372_v51 = vmul.f32 %v371_v50, %v233_v49 }
 0x115   :  { %v374_v52 = vsel %vm373_vm2, %v372_v51, 0.0 }
 0x116   :  { %v375_v53 = vrot.slane %v374_v52, 4 }
 0x118   :  { %v376_v54 = vadd.f32 %v375_v53, %v374_v52 }
 0x11a   :  { %v377_v55 = vrot.slane %v376_v54, 2 }
 0x11c   :  { %v378_v56 = vadd.f32 %v377_v55, %v376_v54 }
 0x11e   :  { %v379_v57 = vrot.slane %v378_v56, 1 }
 0x120   :  { %v380_v59 = vadd.f32 %v379_v57, %v378_v56 }
 0x122   :  { %v381_v60 = vadd.f32 %v380_v59, %v234_v58 }
 0x124   :  { %v382_v62 = vmax.f32 %v381_v60, 0.0 }
 0x126   :  { %v383_v63 = vmul.f32 %v382_v62, %v235_v61 }
 0x128   :  { %v385_v0 = vsel %vm384_vm3, %v383_v63, 0.0 }
 0x129   :  { %386 = vadd.xlane.f32.xlu1 %v385_v0 }
 0x19c   :  { %v387_v3 = vpop.xlane.xlu1 %386 }
 0x19d   :  { %v388_v4 = vadd.f32 %v387_v3, %v236_v2 }
 0x19f   :  { %v444_v5 = vmul.f32 -1.442695, %v388_v4 }
 0x1a1   :  { %448 = vpow2.f32 %v444_v5 }
 0x1a7   :  { %v449_v6 = vpop.eup %448 }
 0x1a8   :  { %v392_v7 = vadd.f32 1.0, %v449_v6 }
 0x1aa   :  { %450 = vrcp.f32 %v392_v7  ;;  %v404_v11 = vand.u32 2147483648, %v392_v7  ;;  %v402_v13 = vand.u32 2147483647, %v392_v7  ;;  %vm398_vm5 = vweird.f32 %v392_v7 }
 0x1ac   :  { %v405_v15 = vor.u32 1.1754944e-38, %v404_v11  ;;  %vm403_vm7 = vcmp.eq.f32.partialorder %v402_v13, 8.507059e+37 }
 0x1b0   :  { %v451_v8 = vpop.eup %450 }
 0x1b1   :  { %v394_v9 = vmul.f32 %v451_v8, %v392_v7  ;;  %vm399_vm4 = vweird.f32 %v451_v8 }
 0x1b2   :  { %vm400_vm6 = vmor %vm398_vm5, %vm399_vm4 }
 0x1b3   :  { %v395_v10 = vsub.f32 1.0, %v394_v9 }
 0x1b5   :  { %v396_v12 = vmul.f32 %v451_v8, %v395_v10 }
 0x1b7   :  { %v397_v14 = vadd.f32 %v451_v8, %v396_v12 }
 0x1b9   :  { %v401_v16 = vsel %vm400_vm6, %v451_v8, %v397_v14 }
 0x1ba   :  { %v406_v17 = vsel %vm403_vm7, %v405_v15, %v401_v16 }
 0x1bb   :  { %410 = vperm.xlu1 %447, %v406_v17  }
 0x22d   :  { %v411_v19 = vpop.permute.xlu1 %410 }
 0x22e   :  { %v414_v20 = vsub.f32 1.0, %v411_v19 }
 0x230   :  { %v415_v21 = vsel %vm413_vm8, %v411_v19, %v414_v20 }
 0x231   :  { %416 = vst [vmem:[%s562_s3] sm:$0x1] %v415_v21 }

</bundles_post_ra>
